<compile_context>
chip_gen: v7x
topology: tpu7x:2x2x1
jax: 0.10.0
libtpu: 0.0.40
codegen_flags: <defaults>
</compile_context>

<pallas_src>
import jax
import jax.numpy as jnp
from jax.experimental import pallas as pl
from jax.experimental.pallas import tpu as pltpu

NUM_CLASSES = 2
MAX_BATCH_TILE = 8192   # large tiles amortize ~0.35 us/step overhead; VMEM use stays tiny


def _round_up(n, m):
    return ((n + m - 1) // m) * m


def _mlp_kernel(x_ref,
                w1_ref, b1_ref,
                w2_ref, b2_ref,
                w3_ref, b3_ref,
                w4_ref, b4_ref,
                o_ref):
    """Whole MLP forward for one batch tile.

    BatchNorm is pre-folded into the weights; Dropout is identity (eval mode).
    """
    cdt = w1_ref.dtype
    # Cast the f32 HBM input inside the kernel (free VPU work hidden under DMA),
    # instead of an extra un-hidden astype pass in the wrapper.
    h = x_ref[...].astype(cdt)

    # Layer 1: (Linear + folded BatchNorm) -> ReLU
    h = jnp.maximum(
        jnp.dot(h, w1_ref[...], preferred_element_type=jnp.float32) + b1_ref[...], 0.0
    ).astype(cdt)
    # Layer 2
    h = jnp.maximum(
        jnp.dot(h, w2_ref[...], preferred_element_type=jnp.float32) + b2_ref[...], 0.0
    ).astype(cdt)
    # Layer 3
    h = jnp.maximum(
        jnp.dot(h, w3_ref[...], preferred_element_type=jnp.float32) + b3_ref[...], 0.0
    ).astype(cdt)
    # Head: Linear(prev_dim, 2).  Narrow (masked) store, but 64x less HBM writeback
    # than a 128-wide padded f32 output.
    # TODO(synk): if profiling on v7x shows the MXU-push slot binding, re-express
    # layer 1 (K=input_dim) as broadcast FMAs on the VPU to drop one LHS stream.
    o_ref[...] = (
        jnp.dot(h, w4_ref[...], preferred_element_type=jnp.float32) + b4_ref[...]
    ).astype(o_ref.dtype)


def _choose_batch_tile(B):
    """Pick a batch tile: >= 2 grid steps (so the 'parallel' batch axis can shard
    across both v7x TensorCores) while keeping tiles as large as possible."""
    if B <= 8:
        return 8
    half = -(-B // 2)                       # cdiv(B, 2)
    return min(MAX_BATCH_TILE, _round_up(half, 8))


def sea_clutter_classifier_forward(x, folded, *, batch_tile=None):
    """Run the classifier forward pass via a single pallas_call.

    x:      [B, input_dim] float32 (cast to the folded params' compute dtype
            inside the kernel).
    folded: dict from fold_params() (BN folded into Linear).
    Returns logits [B, 2] float32.
    """
    B, in_dim = x.shape

    if batch_tile is None:
        batch_tile = _choose_batch_tile(B)
    batch_tile = _round_up(max(int(batch_tile), 8), 8)
    Bp = _round_up(B, batch_tile)

    xp = x
    if Bp != B:
        # Only materialized when the tile does not divide B (rare with the
        # default heuristic); no dtype cast pass in the wrapper.
        xp = jnp.pad(x, ((0, Bp - B), (0, 0)))

    grid = (Bp // batch_tile,)

    param_names = ("w1", "b1", "w2", "b2", "w3", "b3", "w4", "b4")
    params = [folded[n] for n in param_names]

    # Activations are pipelined per grid step; parameters get explicit full-array
    # blocks with a constant index_map so they are fetched once and stay resident.
    in_specs = [pl.BlockSpec((batch_tile, in_dim), lambda i: (i, 0))] + [
        pl.BlockSpec(p.shape, lambda i: (0, 0)) for p in params
    ]
    out_specs = pl.BlockSpec((batch_tile, NUM_CLASSES), lambda i: (i, 0))

    dims = [in_dim] + [folded[f"w{k}"].shape[1] for k in (1, 2, 3, 4)]
    flops = 2 * Bp * sum(a * b for a, b in zip(dims[:-1], dims[1:]))
    bytes_accessed = int(
        xp.size * xp.dtype.itemsize
        + sum(int(p.size * p.dtype.itemsize) for p in params)
        + Bp * NUM_CLASSES * 4
    )
    cost = pl.CostEstimate(flops=flops, transcendentals=0,
                           bytes_accessed=bytes_accessed)

    out = pl.pallas_call(
        _mlp_kernel,
        out_shape=jax.ShapeDtypeStruct((Bp, NUM_CLASSES), jnp.float32),
        grid=grid,
        in_specs=in_specs,
        out_specs=out_specs,
        compiler_params=pltpu.CompilerParams(
            dimension_semantics=("parallel",)),
        cost_estimate=cost,
    )(xp, *params)

    return out[:B]


def init_raw_params(key, input_dim=8, hidden_dims=(64, 32, 16)):
    """Deterministic synthetic parameters with the nn.Module's PyTorch layout:
    Linear weight [out, in] / bias [out]; BatchNorm1d gamma/beta/mean/var [out]."""
    raw = {}
    dims = [input_dim] + list(hidden_dims)
    keys = jax.random.split(key, 4 * len(hidden_dims) + 2)
    k = 0
    for li, (din, dout) in enumerate(zip(dims[:-1], dims[1:]), start=1):
        raw[f"lin{li}_w"] = 0.1 * jax.random.normal(keys[k], (dout, din), jnp.float32); k += 1
        raw[f"lin{li}_b"] = 0.05 * jax.random.normal(keys[k], (dout,), jnp.float32); k += 1
        raw[f"bn{li}_gamma"] = 1.0 + 0.1 * jax.random.normal(keys[k], (dout,), jnp.float32); k += 1
        raw[f"bn{li}_beta"] = 0.05 * jnp.arange(dout, dtype=jnp.float32) / dout
        raw[f"bn{li}_mean"] = 0.01 * jnp.arange(dout, dtype=jnp.float32)
        raw[f"bn{li}_var"] = 1.0 + 0.02 * jnp.arange(dout, dtype=jnp.float32) / dout
    raw["head_w"] = 0.1 * jax.random.normal(keys[k], (NUM_CLASSES, dims[-1]), jnp.float32); k += 1
    raw["head_b"] = 0.05 * jax.random.normal(keys[k], (NUM_CLASSES,), jnp.float32); k += 1
    return raw


def fold_params(raw, *, num_hidden=3, eps=1e-5, compute_dtype=jnp.bfloat16):
    """Fold eval-mode BatchNorm1d into the preceding Linear, transpose weights to
    [in, out], cast weights to `compute_dtype` (biases stay f32)."""
    p = {}
    for li in range(1, num_hidden + 1):
        w = raw[f"lin{li}_w"].T.astype(jnp.float32)          # [in, out]
        b = raw[f"lin{li}_b"].astype(jnp.float32)            # [out]
        scale = raw[f"bn{li}_gamma"] / jnp.sqrt(raw[f"bn{li}_var"] + eps)
        shift = raw[f"bn{li}_beta"] - raw[f"bn{li}_mean"] * scale
        p[f"w{li}"] = (w * scale[None, :]).astype(compute_dtype)
        p[f"b{li}"] = (b * scale + shift).astype(jnp.float32)[None, :]
    p["w4"] = raw["head_w"].T.astype(compute_dtype)          # [prev, 2]
    p["b4"] = raw["head_b"].astype(jnp.float32)[None, :]     # [1, 2]
    return p


def reference_raw_forward(x, raw, *, num_hidden=3, eps=1e-5):
    """Pure-JAX float32 reference of the original module in eval mode."""
    h = x
    for li in range(1, num_hidden + 1):
        h = h @ raw[f"lin{li}_w"].T + raw[f"lin{li}_b"]
        h = (h - raw[f"bn{li}_mean"]) / jnp.sqrt(raw[f"bn{li}_var"] + eps)
        h = h * raw[f"bn{li}_gamma"] + raw[f"bn{li}_beta"]
        h = jnp.maximum(h, 0.0)      # Dropout(0.3) -> identity in eval mode
    return h @ raw["head_w"].T + raw["head_b"]


def reference_folded_forward(x, folded):
    """Pure-JAX reference mirroring the kernel's folded / casted arithmetic."""
    cdt = folded["w1"].dtype
    h = x.astype(cdt)
    for li in (1, 2, 3):
        h = jnp.maximum(
            jnp.dot(h, folded[f"w{li}"], preferred_element_type=jnp.float32)
            + folded[f"b{li}"], 0.0).astype(cdt)
    return jnp.dot(h, folded["w4"], preferred_element_type=jnp.float32) + folded["b4"]


if __name__ == "__main__":
    key = jax.random.PRNGKey(0)
    k_x, k_p = jax.random.split(key)

    B, INPUT_DIM = 16, 8          # [batch_size, input_dim]
    x = jax.random.normal(k_x, (B, INPUT_DIM), jnp.float32)
    raw = init_raw_params(k_p, input_dim=INPUT_DIM, hidden_dims=(64, 32, 16))

    # Fast path: bf16 weights/activations, f32 accumulation (grid=(2,) here so
    # both v7x TensorCores are used; single-TC chips just run 2 steps).
    folded_bf16 = fold_params(raw, compute_dtype=jnp.bfloat16)
    logits = sea_clutter_classifier_forward(x, folded_bf16)
    logits = jax.block_until_ready(logits)
    assert logits.shape == (B, NUM_CLASSES)
    ref_bf16 = reference_folded_forward(x, folded_bf16)
    assert jnp.allclose(logits, ref_bf16, atol=5e-3, rtol=1e-2), \
        "bf16 kernel mismatch vs mirrored reference"

    # f32 path cross-checked against the un-folded eval-mode module semantics
    # (validates the BatchNorm folding itself).
    folded_f32 = fold_params(raw, compute_dtype=jnp.float32)
    logits_f32 = jax.block_until_ready(sea_clutter_classifier_forward(x, folded_f32))
    ref_raw = reference_raw_forward(x, raw)
    assert jnp.allclose(logits_f32, ref_raw, atol=1e-3, rtol=5e-3), \
        "f32 kernel mismatch vs eval-mode module reference"

    print("KERNEL_OK")
</pallas_src>

<mosaic_0001>
module attributes {stable_mosaic.version = 11 : i64} {
  func.func @_mlp_kernel(%arg0: i32, %arg1: memref<8x8xf32, #tpu.memory_space<vmem>>, %arg2: memref<8x64xbf16, #tpu.memory_space<vmem>>, %arg3: memref<1x64xf32, #tpu.memory_space<vmem>>, %arg4: memref<64x32xbf16, #tpu.memory_space<vmem>>, %arg5: memref<1x32xf32, #tpu.memory_space<vmem>>, %arg6: memref<32x16xbf16, #tpu.memory_space<vmem>>, %arg7: memref<1x16xf32, #tpu.memory_space<vmem>>, %arg8: memref<16x2xbf16, #tpu.memory_space<vmem>>, %arg9: memref<1x2xf32, #tpu.memory_space<vmem>>, %arg10: memref<8x2xf32, #tpu.memory_space<vmem>>) attributes {dimension_semantics = [#tpu.dimension_semantics<parallel>], iteration_bounds = array<i64: 2>, scalar_prefetch = 0 : i64, scratch_operands = 0 : i64, tpu.core_type = #tpu.core_type<tc>, window_params = [{transform_indices = @transform_0, window_bounds = array<i64: 8, 8>}, {pipeline_mode = #tpu.pipeline_mode<synchronous>, transform_indices = @transform_1, window_bounds = array<i64: 8, 64>}, {pipeline_mode = #tpu.pipeline_mode<synchronous>, transform_indices = @transform_2, window_bounds = array<i64: 1, 64>}, {pipeline_mode = #tpu.pipeline_mode<synchronous>, transform_indices = @transform_3, window_bounds = array<i64: 64, 32>}, {pipeline_mode = #tpu.pipeline_mode<synchronous>, transform_indices = @transform_4, window_bounds = array<i64: 1, 32>}, {pipeline_mode = #tpu.pipeline_mode<synchronous>, transform_indices = @transform_5, window_bounds = array<i64: 32, 16>}, {pipeline_mode = #tpu.pipeline_mode<synchronous>, transform_indices = @transform_6, window_bounds = array<i64: 1, 16>}, {pipeline_mode = #tpu.pipeline_mode<synchronous>, transform_indices = @transform_7, window_bounds = array<i64: 16, 2>}, {pipeline_mode = #tpu.pipeline_mode<synchronous>, transform_indices = @transform_8, window_bounds = array<i64: 1, 2>}, {transform_indices = @transform_9, window_bounds = array<i64: 8, 2>}]} {
    %c0 = arith.constant 0 : index
    %c0_0 = arith.constant 0 : index
    %0 = vector.load %arg1[%c0, %c0_0] : memref<8x8xf32, #tpu.memory_space<vmem>>, vector<8x8xf32>
    %1 = arith.truncf %0 : vector<8x8xf32> to vector<8x8xbf16>
    %c0_1 = arith.constant 0 : index
    %c0_2 = arith.constant 0 : index
    %2 = vector.load %arg2[%c0_1, %c0_2] : memref<8x64xbf16, #tpu.memory_space<vmem>>, vector<8x64xbf16>
    %cst = arith.constant dense<0.000000e+00> : vector<8x64xf32>
    %3 = tpu.matmul %1, %2, %cst {dimension_numbers = #tpu.dot_dimension_numbers<[1], [0], [0], [1], [0, 0, 1, 1], [], []>} : vector<8x8xbf16>, vector<8x64xbf16>, vector<8x64xf32> -> vector<8x64xf32>
    %c0_3 = arith.constant 0 : index
    %c0_4 = arith.constant 0 : index
    %4 = vector.load %arg3[%c0_3, %c0_4] : memref<1x64xf32, #tpu.memory_space<vmem>>, vector<1x64xf32>
    %5 = vector.broadcast %4 : vector<1x64xf32> to vector<8x64xf32>
    %6 = arith.addf %3, %5 : vector<8x64xf32>
    %cst_5 = arith.constant 0.000000e+00 : f32
    %7 = vector.broadcast %cst_5 : f32 to vector<8x64xf32>
    %8 = arith.maximumf %6, %7 : vector<8x64xf32>
    %9 = arith.truncf %8 : vector<8x64xf32> to vector<8x64xbf16>
    %c0_6 = arith.constant 0 : index
    %c0_7 = arith.constant 0 : index
    %10 = vector.load %arg4[%c0_6, %c0_7] : memref<64x32xbf16, #tpu.memory_space<vmem>>, vector<64x32xbf16>
    %cst_8 = arith.constant dense<0.000000e+00> : vector<8x32xf32>
    %11 = tpu.matmul %9, %10, %cst_8 {dimension_numbers = #tpu.dot_dimension_numbers<[1], [0], [0], [1], [0, 0, 1, 1], [], []>} : vector<8x64xbf16>, vector<64x32xbf16>, vector<8x32xf32> -> vector<8x32xf32>
    %c0_9 = arith.constant 0 : index
    %c0_10 = arith.constant 0 : index
    %12 = vector.load %arg5[%c0_9, %c0_10] : memref<1x32xf32, #tpu.memory_space<vmem>>, vector<1x32xf32>
    %13 = vector.broadcast %12 : vector<1x32xf32> to vector<8x32xf32>
    %14 = arith.addf %11, %13 : vector<8x32xf32>
    %cst_11 = arith.constant 0.000000e+00 : f32
    %15 = vector.broadcast %cst_11 : f32 to vector<8x32xf32>
    %16 = arith.maximumf %14, %15 : vector<8x32xf32>
    %17 = arith.truncf %16 : vector<8x32xf32> to vector<8x32xbf16>
    %c0_12 = arith.constant 0 : index
    %c0_13 = arith.constant 0 : index
    %18 = vector.load %arg6[%c0_12, %c0_13] : memref<32x16xbf16, #tpu.memory_space<vmem>>, vector<32x16xbf16>
    %cst_14 = arith.constant dense<0.000000e+00> : vector<8x16xf32>
    %19 = tpu.matmul %17, %18, %cst_14 {dimension_numbers = #tpu.dot_dimension_numbers<[1], [0], [0], [1], [0, 0, 1, 1], [], []>} : vector<8x32xbf16>, vector<32x16xbf16>, vector<8x16xf32> -> vector<8x16xf32>
    %c0_15 = arith.constant 0 : index
    %c0_16 = arith.constant 0 : index
    %20 = vector.load %arg7[%c0_15, %c0_16] : memref<1x16xf32, #tpu.memory_space<vmem>>, vector<1x16xf32>
    %21 = vector.broadcast %20 : vector<1x16xf32> to vector<8x16xf32>
    %22 = arith.addf %19, %21 : vector<8x16xf32>
    %cst_17 = arith.constant 0.000000e+00 : f32
    %23 = vector.broadcast %cst_17 : f32 to vector<8x16xf32>
    %24 = arith.maximumf %22, %23 : vector<8x16xf32>
    %25 = arith.truncf %24 : vector<8x16xf32> to vector<8x16xbf16>
    %c0_18 = arith.constant 0 : index
    %c0_19 = arith.constant 0 : index
    %26 = vector.load %arg8[%c0_18, %c0_19] : memref<16x2xbf16, #tpu.memory_space<vmem>>, vector<16x2xbf16>
    %cst_20 = arith.constant dense<0.000000e+00> : vector<8x2xf32>
    %27 = tpu.matmul %25, %26, %cst_20 {dimension_numbers = #tpu.dot_dimension_numbers<[1], [0], [0], [1], [0, 0, 1, 1], [], []>} : vector<8x16xbf16>, vector<16x2xbf16>, vector<8x2xf32> -> vector<8x2xf32>
    %c0_21 = arith.constant 0 : index
    %c0_22 = arith.constant 0 : index
    %28 = vector.load %arg9[%c0_21, %c0_22] : memref<1x2xf32, #tpu.memory_space<vmem>>, vector<1x2xf32>
    %29 = vector.broadcast %28 : vector<1x2xf32> to vector<8x2xf32>
    %30 = arith.addf %27, %29 : vector<8x2xf32>
    %c0_23 = arith.constant 0 : index
    %c0_24 = arith.constant 0 : index
    %31 = vector.load %arg10[%c0_23, %c0_24] : memref<8x2xf32, #tpu.memory_space<vmem>>, vector<8x2xf32>
    tpu.vector_store %arg10[%c0_23, %c0_24], %30 {strides = array<i32>} : memref<8x2xf32, #tpu.memory_space<vmem>>, vector<8x2xf32>,
    return
  }
  func.func @transform_0(%arg0: i32) -> (i32, i32) {
    %c0_i32 = arith.constant 0 : i32
    %c0_i32_0 = arith.constant 0 : i32
    return %arg0, %c0_i32 : i32, i32
  }
  func.func @transform_1(%arg0: i32) -> (i32, i32) {
    %c0_i32 = arith.constant 0 : i32
    %c0_i32_0 = arith.constant 0 : i32
    %c0_i32_1 = arith.constant 0 : i32
    return %c0_i32, %c0_i32_0 : i32, i32
  }
  func.func @transform_2(%arg0: i32) -> (i32, i32) {
    %c0_i32 = arith.constant 0 : i32
    %c0_i32_0 = arith.constant 0 : i32
    %c0_i32_1 = arith.constant 0 : i32
    return %c0_i32, %c0_i32_0 : i32, i32
  }
  func.func @transform_3(%arg0: i32) -> (i32, i32) {
    %c0_i32 = arith.constant 0 : i32
    %c0_i32_0 = arith.constant 0 : i32
    %c0_i32_1 = arith.constant 0 : i32
    return %c0_i32, %c0_i32_0 : i32, i32
  }
  func.func @transform_4(%arg0: i32) -> (i32, i32) {
    %c0_i32 = arith.constant 0 : i32
    %c0_i32_0 = arith.constant 0 : i32
    %c0_i32_1 = arith.constant 0 : i32
    return %c0_i32, %c0_i32_0 : i32, i32
  }
  func.func @transform_5(%arg0: i32) -> (i32, i32) {
    %c0_i32 = arith.constant 0 : i32
    %c0_i32_0 = arith.constant 0 : i32
    %c0_i32_1 = arith.constant 0 : i32
    return %c0_i32, %c0_i32_0 : i32, i32
  }
  func.func @transform_6(%arg0: i32) -> (i32, i32) {
    %c0_i32 = arith.constant 0 : i32
    %c0_i32_0 = arith.constant 0 : i32
    %c0_i32_1 = arith.constant 0 : i32
    return %c0_i32, %c0_i32_0 : i32, i32
  }
  func.func @transform_7(%arg0: i32) -> (i32, i32) {
    %c0_i32 = arith.constant 0 : i32
    %c0_i32_0 = arith.constant 0 : i32
    %c0_i32_1 = arith.constant 0 : i32
    return %c0_i32, %c0_i32_0 : i32, i32
  }
  func.func @transform_8(%arg0: i32) -> (i32, i32) {
    %c0_i32 = arith.constant 0 : i32
    %c0_i32_0 = arith.constant 0 : i32
    %c0_i32_1 = arith.constant 0 : i32
    return %c0_i32, %c0_i32_0 : i32, i32
  }
  func.func @transform_9(%arg0: i32) -> (i32, i32) {
    %c0_i32 = arith.constant 0 : i32
    %c0_i32_0 = arith.constant 0 : i32
    return %arg0, %c0_i32 : i32, i32
  }
}

</mosaic_0001>

<bundles_post_ra>
// kernel: tpu_custom_call.1
= control target key start
LH: loop header
LB: loop body
LE: loop exit
PB: predicated region body
PF: predicated region fallthrough
CT: control target
= control target key end

     0   :  { %s802_s30 = smov 0   ;;  %s866_s0 = inlined_call_operand.vmem [shape: f32[16,8], index: 0, kind: input, shape index: {}]   ;;  %s867_s1 = inlined_call_operand.vmem [shape: bf16[8,64], index: 1, kind: input, shape index: {}]   ;;  %s868_s2 = inlined_call_operand.vmem [shape: f32[1,64], index: 2, kind: input, shape index: {}]   ;;  %s869_s3 = inlined_call_operand.vmem [shape: bf16[64,32], index: 3, kind: input, shape index: {}]   ;;  %s870_s4 = inlined_call_operand.vmem [shape: f32[1,32], index: 4, kind: input, shape index: {}]   ;;  %s871_s5 = inlined_call_operand.vmem [shape: bf16[32,16], index: 5, kind: input, shape index: {}]   ;;  %s872_s6 = inlined_call_operand.vmem [shape: f32[1,16], index: 6, kind: input, shape index: {}]   ;;  %s873_s7 = inlined_call_operand.vmem [shape: bf16[16,2], index: 7, kind: input, shape index: {}]   ;;  %s874_s8 = inlined_call_operand.vmem [shape: f32[1,2], index: 8, kind: input, shape index: {}]   ;;  %s875_s9 = inlined_call_operand.vmem [shape: f32[16,2], index: 9, kind: output, shape index: {}]  }
   0x1 LB: > { %s657_s10 = sadd.s32 4294967295, %s748_s30   ;;  %p661_p0 = scmp.ge.s32.totalorder %s748_s30, 1  ;;  %s748_s30 = sphi %s802_s30, %s19_s30  }
   0x2   : > { %p286_p1 = scmp.lt.s32.totalorder %s748_s30, 3 }
   0x4   : > { %p287_p2 = pnand %p661_p0, %p286_p1 }
   0x5   : > { %v331_v0 = vld [vmem:[%s867_s1] sm:$0xf] (!%p287_p2)  ;;  %vm343_vm0 = vcmask (!%p287_p2), 1043456   ;;  %p320_p3 = scmp.lt.s32.totalorder (!%p287_p2), %s657_s10, 1  ;;  %v750_v1 = vmov (!%p287_p2), 0.0   ;;  %vm751_vm1 = vmmov (!%p287_p2), 0  }
   0x6   : > { %290 = sbr.rel (%p287_p2) target bundleno = 888 (0x378), region = 56  ;;  %693 = vmatprep.subr.bf16.mxu0 (!%p287_p2), %v750_v1  ;;  %v345_v2 = vsel (!%p287_p2), %vm343_vm0, %v331_v0, 0  ;;  %695 = vmatprep.mubr.msk.bf16.mxu0 (!%p287_p2), %vm751_vm1, %v750_v1  ;;  %v735_v3 = vld [vmem:[%s869_s3] sm:$0xff] (!%p287_p2)   ;;  %v736_v4 = vld [vmem:[%s869_s3 + $0x8] sm:$0xff] (!%p287_p2)   ;;  %vm339_vm2 = vcmask (!%p287_p2), 64512   ;;  %v737_v7 = vld [vmem:[%s869_s3 + $0x10] sm:$0xff] (!%p287_p2)  }
   0x7   : > { %694 = vmatpush3.bf16.msra.mxu0 (!%p287_p2), %v345_v2  ;;  %699 = vmatprep.subr.bf16.mxu1 (!%p287_p2), %v750_v1  ;;  %v738_v8 = vld [vmem:[%s869_s3 + $0x18] sm:$0xff] (!%p287_p2)   ;;  %v739_v9 = vld [vmem:[%s871_s5] sm:$0xff] (!%p287_p2)   ;;  %vm428_vm3 = vcmask (!%p287_p2), 523264   ;;  %v740_v18 = vld [vmem:[%s871_s5 + $0x8] sm:$0xff] (!%p287_p2)   ;;  %vm497_vm4 = vcmask (!%p287_p2), 261120   ;;  %vm558_vm5 = vcmask (!%p287_p2), 130048  }
   0x8   : > { %707 = vmatprep.mubr.msk.bf16.mxu1 (!%p287_p2), %vm751_vm1, %v750_v1  ;;  %711 = vmatprep.subr.bf16.mxu0 (!%p287_p2), %v750_v1  ;;  %v664_v10 = vld [vmem:[%s868_s2] ss:$0 sm:$0xff] (!%p287_p2)  ;;  %vm602_vm6 = vcmask (!%p287_p2), 15360  }
   0x9   : > { %700 = vmatpush3.bf16.msra.mxu1 (!%p287_p2), %v735_v3  ;;  %v666_v19 = vld [vmem:[%s870_s4] ss:$0 sm:$0xff] (!%p287_p2) }
   0xa   : > { %701 = vmatprep.subr.bf16.mxu1 (!%p287_p2), %v750_v1  ;;  %v741_v26 = vld [vmem:[%s873_s7] sm:$0xff] (!%p287_p2)  }
   0xb   : > { %v672_v28 = vld [vmem:[%s872_s6] ss:$0 sm:$0xff] (!%p287_p2) }
   0xc   : > { %v676_v36 = vld [vmem:[%s874_s8] ss:$0 sm:$0xff] (!%p287_p2) }
   0xd   : > { %s877_s10 = smov (!%p320_p3, %s657_s10), 1  ;;  %702 = vmatpush3.bf16.msra.mxu1 %v736_v4 }
   0xe   : > { %s662_s15 = sshll.u32 %s877_s10, 3  ;;  %703 = vmatprep.subr.bf16.mxu1 %v750_v1 }
   0xf   : > { %s323_s20 = scalar_lea.vmem %s866_s0, %s662_s15  ;;  %s327_s23 = scalar_lea.vmem %s875_s9, %s662_s15 }
  0x10   : > { %v329_v5 = vld [vmem:[%s323_s20] sm:$0xff] }
  0x11   : > { %v330_v6 = vpack.c.bf16 %v329_v5, %v329_v5  ;;  %704 = vmatpush3.bf16.msra.mxu1 %v737_v7 }
  0x12   : > { %705 = vmatprep.subr.bf16.mxu1 %v750_v1 }
  0x13   : > { %696 = vmatmul.mubr.msk.bf16.vlgmr.msra.gmra.mrb[0].mxu0 %vm339_vm2, %v330_v6 }
  0x14   : > { %715 = vmatprep.mubr.msk.bf16.mxu0 %vm751_vm1, %v750_v1  ;;  %712 = vmatpush3.bf16.msra.mxu0 %v739_v9 }
  0x15   : > { %706 = vmatpush3.bf16.msra.mxu1 %v738_v8  ;;  %713 = vmatprep.subr.bf16.mxu0 %v750_v1 }
  0x18   : > { %714 = vmatpush3.bf16.msra.mxu0 %v740_v18 }
  0x19   : > { %719 = vmatprep.subr.bf16.mxu0 %v750_v1 }
  0xe6   : > { %v381_v11 = vpop.f32.mrb[0].mxu0 }
  0xe7   : > { %v382_v12 = vadd.f32 %v664_v10, %v381_v11  ;;  %v697_v13 = vpop.f32.mrb[1].mxu0 }
  0xe8   : > { %v384_v14 = vpop.f32.mrb[2].mxu0 }
  0xe9   : > { %v387_v15 = vmax.f32 %v382_v12, 0.0  ;;  %v698_v16 = vpop.f32.mrb[3].mxu0 }
  0xeb   : > { %v388_v17 = vpack.c.bf16 %v387_v15, %v387_v15 }
  0xed   : > { %708 = vmatmul.mubr.msk.bf16.vlgmr.msra.gmra.mrb[0].mxu1 %vm428_vm3, %v388_v17 }
 0x1c0   : > { %v466_v20 = vpop.f32.mrb[0].mxu1 }
 0x1c1   : > { %v467_v21 = vadd.f32 %v666_v19, %v466_v20  ;;  %v709_v22 = vpop.f32.mrb[1].mxu1 }
 0x1c2   : > { %v469_v23 = vpop.f32.mrb[2].mxu1 }
 0x1c3   : > { %v472_v24 = vmax.f32 %v467_v21, 0.0  ;;  %v710_v25 = vpop.f32.mrb[3].mxu1 }
 0x1c5   : > { %v473_v27 = vpack.c.bf16 %v472_v24, %v472_v24 }
 0x1c7   : > { %716 = vmatmul.mubr.msk.bf16.vlgmr.msra.gmra.mrb[4].mxu0 %vm497_vm4, %v473_v27 }
 0x1c8   : > { %720 = vmatpush3.bf16.msra.mxu0 %v741_v26  ;;  %721 = vmatprep.mubr.msk.bf16.mxu0 %vm751_vm1, %v750_v1 }
 0x29a   : > { %v535_v29 = vpop.f32.mrb[4].mxu0 }
 0x29b   : > { %v536_v30 = vadd.f32 %v672_v28, %v535_v29  ;;  %v717_v31 = vpop.f32.mrb[5].mxu0 }
 0x29c   : > { %v538_v32 = vpop.f32.mrb[6].mxu0 }
 0x29d   : > { %v541_v33 = vmax.f32 %v536_v30, 0.0  ;;  %v718_v34 = vpop.f32.mrb[7].mxu0 }
 0x29f   : > { %v542_v35 = vpack.c.bf16 %v541_v33, %v541_v33 }
 0x2a1   : > { %722 = vmatmul.mubr.msk.bf16.vlgmr.msra.gmra.mrb[8].mxu0 %vm558_vm5, %v542_v35 }
 0x374   : > { %v596_v37 = vpop.f32.mrb[8].mxu0 }
 0x375   : > { %v597_v38 = vadd.f32 %v676_v36, %v596_v37  ;;  %v723_v39 = vpop.f32.mrb[9].mxu0 }
 0x376   : > { %v599_v40 = vpop.f32.mrb[10].mxu0 }
 0x377   : > { %603 = vst.msk [vmem:[%s327_s23] sm:$0xff] %vm602_vm6, %v597_v38  ;;  %v724_v41 = vpop.f32.mrb[11].mxu0 }
 0x378 PF: > { %s19_s30 = sadd.s32 1, %s748_s30  }
 0x379   : > { %p16_p4 = scmp.ge.s32.totalorder %s19_s30, 4  }
 0x37b   :  { %18 = sbr.rel (!%p16_p4) target bundleno = 1 (0x1), region = 86 }

</bundles_post_ra>
